<compile_context>
chip_gen: v5e
topology: v5e:2x2
jax: 0.10.0
libtpu: 0.0.40
codegen_flags: <defaults>
</compile_context>

<pallas_src>
import jax
import jax.numpy as jnp
from jax.experimental import pallas as pl
from jax.experimental.pallas import tpu as pltpu


def _make_lf_tile_kernel(TB):
    """Kernel: gather TB user rows + TB biz rows, fused dot + bias, one store."""

    def kernel(uid_ref, bid_ref,          # SMEM scalar-prefetched ids, (Bp,)
               bias_ref,                  # (1, TB) gathered bias sums
               uemb_hbm, bemb_hbm,        # full tables, left in HBM (pl.ANY)
               out_ref,                   # (1, TB) lane-dense output tile
               ubuf, bbuf, sems):         # VMEM scratch + DMA semaphores
        t = pl.program_id(0)
        base = t * TB

        # Issue all 2*TB row gathers for this tile; every DMA is in flight
        # before we wait on any of them.
        @pl.loop(0, TB)
        def _issue(r):
            u = uid_ref[base + r]
            b = bid_ref[base + r]
            pltpu.make_async_copy(uemb_hbm.at[u], ubuf.at[r], sems.at[0]).start()
            pltpu.make_async_copy(bemb_hbm.at[b], bbuf.at[r], sems.at[1]).start()

        # Drain: one wait per issued copy (all copies on a semaphore have the
        # same byte count, so dummy-index wait descriptors are fine).
        @pl.loop(0, TB)
        def _drain(r):
            pltpu.make_async_copy(uemb_hbm.at[0], ubuf.at[0], sems.at[0]).wait()
            pltpu.make_async_copy(bemb_hbm.at[0], bbuf.at[0], sems.at[1]).wait()

        # One vectorized multiply-reduce for the whole tile (VPU + XLU lane
        # reduce; no MXU), add the pre-gathered biases, single lane-dense
        # (1, TB) store.
        dots = jnp.sum(ubuf[...] * bbuf[...], axis=-1)          # (TB,)
        out_ref[...] = dots.reshape(1, TB) + bias_ref[...]

    return kernel


@jax.jit
def latent_factorization_forward(user_ids, business_ids,
                                 user_emb, business_emb,
                                 user_bias, business_bias):
    """user_ids, business_ids: (B,) int. Returns (B,) float32 predictions."""
    B = int(user_ids.shape[0])
    U, D = (int(s) for s in user_emb.shape)
    V = int(business_emb.shape[0])

    TB = 128                               # lane-dense output tile
    num_tiles = max(1, pl.cdiv(B, TB))
    Bp = num_tiles * TB

    # Clip ids so a bad id can never trigger an out-of-bounds row DMA.
    # TODO(synk): PyTorch raises on out-of-range ids; here they are clamped.
    uid = jnp.clip(user_ids.astype(jnp.int32), 0, U - 1)
    bid = jnp.clip(business_ids.astype(jnp.int32), 0, V - 1)
    uid_p = jnp.pad(uid, (0, Bp - B))      # pad with valid id 0
    bid_p = jnp.pad(bid, (0, Bp - B))

    # Biases: tiny B-element XLA gather in the wrapper, passed to the kernel
    # as one lane-dense (num_tiles, TB) input (no table rebuild, no bias fold).
    bias_sum = (user_bias.astype(jnp.float32)[uid, 0]
                + business_bias.astype(jnp.float32)[bid, 0])
    bias_sum = jnp.pad(bias_sum, (0, Bp - B)).reshape(num_tiles, TB)

    kernel = _make_lf_tile_kernel(TB)

    grid_spec = pltpu.PrefetchScalarGridSpec(
        num_scalar_prefetch=2,             # uid_p, bid_p -> SMEM
        grid=(num_tiles,),
        in_specs=[
            pl.BlockSpec((1, TB), lambda t, uid_r, bid_r: (t, 0)),   # bias tile
            pl.BlockSpec(memory_space=pl.ANY),                       # user table
            pl.BlockSpec(memory_space=pl.ANY),                       # biz table
        ],
        out_specs=pl.BlockSpec((1, TB), lambda t, uid_r, bid_r: (t, 0)),
        scratch_shapes=[
            pltpu.VMEM((TB, D), jnp.float32),   # gathered user rows
            pltpu.VMEM((TB, D), jnp.float32),   # gathered biz rows
            pltpu.SemaphoreType.DMA((2,)),      # one sem per table
        ],
    )

    out = pl.pallas_call(
        kernel,
        out_shape=jax.ShapeDtypeStruct((num_tiles, TB), jnp.float32),
        grid_spec=grid_spec,
        compiler_params=pltpu.CompilerParams(
            dimension_semantics=("parallel",)),   # v7x megacore when num_tiles>1
    )(uid_p, bid_p, bias_sum,
      user_emb.astype(jnp.float32), business_emb.astype(jnp.float32))

    return out.reshape(Bp)[:B]


def _reference(user_ids, business_ids, user_emb, business_emb,
               user_bias, business_bias):
    u = user_emb[user_ids]              # (B, D)
    b = business_emb[business_ids]      # (B, D)
    ub = user_bias[user_ids, 0]         # (B,)
    bb = business_bias[business_ids, 0]
    return jnp.sum(u * b, axis=1) + ub + bb


if __name__ == "__main__":
    # Small synthetic configuration consistent with the module.
    num_users = 64
    num_businesses = 48
    embedding_dim = 32
    batch = 8

    key = jax.random.PRNGKey(0)
    k1, k2, k3, k4, k5, k6 = jax.random.split(key, 6)

    # torch.nn.Embedding default init: N(0, 1)
    user_emb = jax.random.normal(k1, (num_users, embedding_dim), jnp.float32)
    business_emb = jax.random.normal(k2, (num_businesses, embedding_dim),
                                     jnp.float32)
    user_bias = jax.random.normal(k3, (num_users, 1), jnp.float32)
    business_bias = jax.random.normal(k4, (num_businesses, 1), jnp.float32)

    user_ids = jax.random.randint(k5, (batch,), 0, num_users, jnp.int32)
    business_ids = jax.random.randint(k6, (batch,), 0, num_businesses, jnp.int32)

    preds = latent_factorization_forward(user_ids, business_ids,
                                         user_emb, business_emb,
                                         user_bias, business_bias)
    preds = jax.block_until_ready(preds)

    ref = _reference(user_ids, business_ids, user_emb, business_emb,
                     user_bias, business_bias)
    assert preds.shape == (batch,)
    assert jnp.allclose(preds, ref, atol=1e-4, rtol=1e-4), (preds, ref)

    print("KERNEL_OK")
</pallas_src>

<mosaic_0001>
module attributes {stable_mosaic.version = 11 : i64} {
  func.func @kernel(%arg0: i32, %arg1: memref<128xi32, #tpu.memory_space<smem>>, %arg2: memref<128xi32, #tpu.memory_space<smem>>, %arg3: memref<1x128xf32, #tpu.memory_space<vmem>>, %arg4: memref<64x32xf32, #tpu.memory_space<any>>, %arg5: memref<48x32xf32, #tpu.memory_space<any>>, %arg6: memref<1x128xf32, #tpu.memory_space<vmem>>, %arg7: memref<128x32xf32, #tpu.memory_space<vmem>>, %arg8: memref<128x32xf32, #tpu.memory_space<vmem>>, %arg9: memref<2x!tpu.dma_semaphore, #tpu.memory_space<semaphore_mem>>) attributes {dimension_semantics = [#tpu.dimension_semantics<parallel>], iteration_bounds = array<i64: 1>, scalar_prefetch = 2 : i64, scratch_operands = 3 : i64, tpu.core_type = #tpu.core_type<tc>, window_params = [{transform_indices = @transform_0, window_bounds = array<i64: 1, 128>}, {}, {}, {transform_indices = @transform_3, window_bounds = array<i64: 1, 128>}]} {
    %c128_i32 = arith.constant 128 : i32
    %0 = arith.muli %arg0, %c128_i32 : i32
    %c0_i32 = arith.constant 0 : i32
    %c128_i32_0 = arith.constant 128 : i32
    %1 = arith.addi %c0_i32, %c128_i32_0 : i32
    %c1_i32 = arith.constant 1 : i32
    scf.for %arg10 = %c0_i32 to %1 step %c1_i32  : i32 {
      %c1_i32_12 = arith.constant 1 : i32
      %11 = arith.muli %arg10, %c1_i32_12 : i32
      %c0_i32_13 = arith.constant 0 : i32
      %12 = arith.addi %c0_i32_13, %11 : i32
      %13 = arith.addi %0, %12 : i32
      %14 = arith.index_cast %13 : i32 to index
      %15 = memref.load %arg1[%14] : memref<128xi32, #tpu.memory_space<smem>>
      %16 = arith.addi %0, %12 : i32
      %17 = arith.index_cast %16 : i32 to index
      %18 = memref.load %arg2[%17] : memref<128xi32, #tpu.memory_space<smem>>
      %c0_i32_14 = arith.constant 0 : i32
      %c0_i32_15 = arith.constant 0 : i32
      %19 = tpu.memref_slice %arg4[%15, %c0_i32_15] : memref<64x32xf32, #tpu.memory_space<any>> -> memref<1x32xf32, #tpu.memory_space<any>>
      %20 = tpu.memref_squeeze %19 : memref<1x32xf32, #tpu.memory_space<any>> -> memref<32xf32, #tpu.memory_space<any>>
      %c0_i32_16 = arith.constant 0 : i32
      %21 = tpu.memref_slice %arg7[%12, %c0_i32_16] : memref<128x32xf32, #tpu.memory_space<vmem>> -> memref<1x32xf32, #tpu.memory_space<vmem>>
      %22 = tpu.memref_squeeze %21 : memref<1x32xf32, #tpu.memory_space<vmem>> -> memref<32xf32, #tpu.memory_space<vmem>>
      %23 = tpu.memref_slice %arg9[%c0_i32_14] : memref<2x!tpu.dma_semaphore, #tpu.memory_space<semaphore_mem>> -> memref<1x!tpu.dma_semaphore, #tpu.memory_space<semaphore_mem>>
      %24 = tpu.memref_squeeze %23 : memref<1x!tpu.dma_semaphore, #tpu.memory_space<semaphore_mem>> -> memref<!tpu.dma_semaphore, #tpu.memory_space<semaphore_mem>>
      tpu.enqueue_dma source(%20 : memref<32xf32, #tpu.memory_space<any>>) target(%22 : memref<32xf32, #tpu.memory_space<vmem>>) target_semaphore(%24 : memref<!tpu.dma_semaphore, #tpu.memory_space<semaphore_mem>>)
      %c1_i32_17 = arith.constant 1 : i32
      %c0_i32_18 = arith.constant 0 : i32
      %25 = tpu.memref_slice %arg5[%18, %c0_i32_18] : memref<48x32xf32, #tpu.memory_space<any>> -> memref<1x32xf32, #tpu.memory_space<any>>
      %26 = tpu.memref_squeeze %25 : memref<1x32xf32, #tpu.memory_space<any>> -> memref<32xf32, #tpu.memory_space<any>>
      %c0_i32_19 = arith.constant 0 : i32
      %27 = tpu.memref_slice %arg8[%12, %c0_i32_19] : memref<128x32xf32, #tpu.memory_space<vmem>> -> memref<1x32xf32, #tpu.memory_space<vmem>>
      %28 = tpu.memref_squeeze %27 : memref<1x32xf32, #tpu.memory_space<vmem>> -> memref<32xf32, #tpu.memory_space<vmem>>
      %29 = tpu.memref_slice %arg9[%c1_i32_17] : memref<2x!tpu.dma_semaphore, #tpu.memory_space<semaphore_mem>> -> memref<1x!tpu.dma_semaphore, #tpu.memory_space<semaphore_mem>>
      %30 = tpu.memref_squeeze %29 : memref<1x!tpu.dma_semaphore, #tpu.memory_space<semaphore_mem>> -> memref<!tpu.dma_semaphore, #tpu.memory_space<semaphore_mem>>
      tpu.enqueue_dma source(%26 : memref<32xf32, #tpu.memory_space<any>>) target(%28 : memref<32xf32, #tpu.memory_space<vmem>>) target_semaphore(%30 : memref<!tpu.dma_semaphore, #tpu.memory_space<semaphore_mem>>)
    }
    %c128_i32_1 = arith.constant 128 : i32
    %c0_i32_2 = arith.constant 0 : i32
    %c128_i32_3 = arith.constant 128 : i32
    %2 = arith.addi %c0_i32_2, %c128_i32_3 : i32
    %c1_i32_4 = arith.constant 1 : i32
    scf.for %arg10 = %c0_i32_2 to %2 step %c1_i32_4  : i32 {
      %c0_i32_12 = arith.constant 0 : i32
      %c0_i32_13 = arith.constant 0 : i32
      %c0_i32_14 = arith.constant 0 : i32
      %c0_i32_15 = arith.constant 0 : i32
      %11 = tpu.memref_slice %arg4[%c0_i32_12, %c0_i32_15] : memref<64x32xf32, #tpu.memory_space<any>> -> memref<1x32xf32, #tpu.memory_space<any>>
      %12 = tpu.memref_squeeze %11 : memref<1x32xf32, #tpu.memory_space<any>> -> memref<32xf32, #tpu.memory_space<any>>
      %c0_i32_16 = arith.constant 0 : i32
      %13 = tpu.memref_slice %arg7[%c0_i32_13, %c0_i32_16] : memref<128x32xf32, #tpu.memory_space<vmem>> -> memref<1x32xf32, #tpu.memory_space<vmem>>
      %14 = tpu.memref_squeeze %13 : memref<1x32xf32, #tpu.memory_space<vmem>> -> memref<32xf32, #tpu.memory_space<vmem>>
      %15 = tpu.memref_slice %arg9[%c0_i32_14] : memref<2x!tpu.dma_semaphore, #tpu.memory_space<semaphore_mem>> -> memref<1x!tpu.dma_semaphore, #tpu.memory_space<semaphore_mem>>
      %16 = tpu.memref_squeeze %15 : memref<1x!tpu.dma_semaphore, #tpu.memory_space<semaphore_mem>> -> memref<!tpu.dma_semaphore, #tpu.memory_space<semaphore_mem>>
      tpu.wait_dma2 semaphore(%16 : memref<!tpu.dma_semaphore, #tpu.memory_space<semaphore_mem>>) src(%12 : memref<32xf32, #tpu.memory_space<any>>) dst(%14 : memref<32xf32, #tpu.memory_space<vmem>>)
      %c0_i32_17 = arith.constant 0 : i32
      %c0_i32_18 = arith.constant 0 : i32
      %c1_i32_19 = arith.constant 1 : i32
      %c0_i32_20 = arith.constant 0 : i32
      %17 = tpu.memref_slice %arg5[%c0_i32_17, %c0_i32_20] : memref<48x32xf32, #tpu.memory_space<any>> -> memref<1x32xf32, #tpu.memory_space<any>>
      %18 = tpu.memref_squeeze %17 : memref<1x32xf32, #tpu.memory_space<any>> -> memref<32xf32, #tpu.memory_space<any>>
      %c0_i32_21 = arith.constant 0 : i32
      %19 = tpu.memref_slice %arg8[%c0_i32_18, %c0_i32_21] : memref<128x32xf32, #tpu.memory_space<vmem>> -> memref<1x32xf32, #tpu.memory_space<vmem>>
      %20 = tpu.memref_squeeze %19 : memref<1x32xf32, #tpu.memory_space<vmem>> -> memref<32xf32, #tpu.memory_space<vmem>>
      %21 = tpu.memref_slice %arg9[%c1_i32_19] : memref<2x!tpu.dma_semaphore, #tpu.memory_space<semaphore_mem>> -> memref<1x!tpu.dma_semaphore, #tpu.memory_space<semaphore_mem>>
      %22 = tpu.memref_squeeze %21 : memref<1x!tpu.dma_semaphore, #tpu.memory_space<semaphore_mem>> -> memref<!tpu.dma_semaphore, #tpu.memory_space<semaphore_mem>>
      tpu.wait_dma2 semaphore(%22 : memref<!tpu.dma_semaphore, #tpu.memory_space<semaphore_mem>>) src(%18 : memref<32xf32, #tpu.memory_space<any>>) dst(%20 : memref<32xf32, #tpu.memory_space<vmem>>)
    }
    %c0 = arith.constant 0 : index
    %c0_5 = arith.constant 0 : index
    %3 = vector.load %arg7[%c0, %c0_5] : memref<128x32xf32, #tpu.memory_space<vmem>>, vector<128x32xf32>
    %c0_6 = arith.constant 0 : index
    %c0_7 = arith.constant 0 : index
    %4 = vector.load %arg8[%c0_6, %c0_7] : memref<128x32xf32, #tpu.memory_space<vmem>>, vector<128x32xf32>
    %5 = arith.mulf %3, %4 : vector<128x32xf32>
    %cst = arith.constant dense<0.000000e+00> : vector<128xf32>
    %6 = vector.multi_reduction <add>, %5, %cst [1] : vector<128x32xf32> to vector<128xf32>
    %7 = vector.shape_cast %6 : vector<128xf32> to vector<1x128xf32>
    %c0_8 = arith.constant 0 : index
    %c0_9 = arith.constant 0 : index
    %8 = vector.load %arg3[%c0_8, %c0_9] : memref<1x128xf32, #tpu.memory_space<vmem>>, vector<1x128xf32>
    %9 = arith.addf %7, %8 : vector<1x128xf32>
    %c0_10 = arith.constant 0 : index
    %c0_11 = arith.constant 0 : index
    %10 = vector.load %arg6[%c0_10, %c0_11] : memref<1x128xf32, #tpu.memory_space<vmem>>, vector<1x128xf32>
    tpu.vector_store %arg6[%c0_10, %c0_11], %9 {strides = array<i32>} : memref<1x128xf32, #tpu.memory_space<vmem>>, vector<1x128xf32>,
    return
  }
  func.func @transform_0(%arg0: i32, %arg1: memref<128xi32, #tpu.memory_space<smem>>, %arg2: memref<128xi32, #tpu.memory_space<smem>>) -> (i32, i32) {
    %c0_i32 = arith.constant 0 : i32
    %c0_i32_0 = arith.constant 0 : i32
    return %arg0, %c0_i32 : i32, i32
  }
  func.func @transform_3(%arg0: i32, %arg1: memref<128xi32, #tpu.memory_space<smem>>, %arg2: memref<128xi32, #tpu.memory_space<smem>>) -> (i32, i32) {
    %c0_i32 = arith.constant 0 : i32
    %c0_i32_0 = arith.constant 0 : i32
    return %arg0, %c0_i32 : i32, i32
  }
}

</mosaic_0001>

<bundles_post_ra>
// kernel: latent_factorization_forward.1
= control target key start
LH: loop header
LB: loop body
LE: loop exit
PB: predicated region body
PF: predicated region fallthrough
CT: control target
= control target key end

     0   :  { %s602_s24 = smov [#allocation6]   ;;  %s603_s25 = smov [#allocation7]   ;;  %s689_s0 = inlined_call_operand.vmem [shape: s32[128], index: 0, kind: input, shape index: {}]   ;;  %s690_s2 = inlined_call_operand.vmem [shape: f32[1,128], index: 2, kind: input, shape index: {}]   ;;  %s691_s3 = inlined_call_operand.vmem [shape: f32[64,32], index: 3, kind: input, shape index: {}]   ;;  %s692_s4 = inlined_call_operand.vmem [shape: f32[48,32], index: 4, kind: input, shape index: {}]   ;;  %s693_s5 = inlined_call_operand.vmem [shape: f32[1,128], index: 5, kind: output, shape index: {}]   ;;  %s694_s1 = inlined_call_operand.vmem [shape: s32[128], index: 1, kind: input, shape index: {}]  }
   0x1   :  { %s11_s20 = sshll.u32 %s689_s0, 4  ;;  %s16_s23 = sshll.u32 %s694_s1, 4  ;;  %s12_s20 = int_to_ptr.vmem [resolvable:$true] %s11_s20  ;;  %s17_s23 = int_to_ptr.vmem [resolvable:$true] %s16_s23 }
   0x2   :  { %14 = dma.vmem_to_smem %s12_s20, 16, %s602_s24, [#allocation5] }
   0x3   :  { %19 = dma.vmem_to_smem %s17_s23, 16, %s603_s25, [#allocation5] }
   0x4   :  { %588 = dma.done.wait [#allocation5], 32 }
   0x5   :  { %589 = vsyncadd [#allocation5], 4294967264 }
   0x6   :  { %22 = sfence }
   0x7   :  { %s594_s26 = smov 0  }
   0x8 LB: > { %s33_s27 = sld [smem:[#allocation6 + %s596_s26]]  ;;  %s36_s1 = scalar_lea.vmem [#allocation2], %s596_s26  ;;  %s596_s26 = sphi %s594_s26, %s31_s26  }
   0x9   : > { %s34_s28 = sld [smem:[#allocation7 + %s596_s26]] }
   0xe   : > { %s35_s30 = scalar_lea.vmem %s691_s3, %s33_s27 }
   0xf   : > { %v51_v0 = vld [vmem:[%s35_s30] sm:$0x1] }
  0x10   : > { %52 = vst [vmem:[%s36_s1] sm:$0x1] %v51_v0 }
  0x11   : > { %70 = vsyncadd [#allocation4], 16  ;;  %s71_s8 = scalar_lea.vmem %s692_s4, %s34_s28  ;;  %s72_s9 = scalar_lea.vmem [#allocation3], %s596_s26 }
  0x12   : > { %v88_v1 = vld [vmem:[%s71_s8] sm:$0x1] }
  0x13   : > { %89 = vst [vmem:[%s72_s9] sm:$0x1] %v88_v1 }
  0x14   : > { %107 = vsyncadd [#allocation4 + $0x1], 16  ;;  %s31_s26 = sadd.s32 1, %s596_s26  }
  0x15   : > { %p28_p0 = scmp.ge.s32.totalorder %s31_s26, 128  }
  0x16   :  { %s598_s10 = smov (%p28_p0), 0  }
  0x17   :  { %30 = sbr.rel (!%p28_p0) target bundleno = 8 (0x8), region = 113 }
  0x1c LB: > { %590 = dma.done.wait [#allocation4], 16  ;;  %s600_s10 = sphi %s598_s10, %s113_s10  }
  0x1d   : > { %591 = vsyncadd [#allocation4], 4294967280 }
  0x1e   : > { %592 = dma.done.wait [#allocation4 + $0x1], 16 }
  0x1f   : > { %593 = vsyncadd [#allocation4 + $0x1], 4294967280  ;;  %s113_s10 = sadd.s32 1, %s600_s10  }
  0x20   : > { %p110_p1 = scmp.ge.s32.totalorder %s113_s10, 128  }
  0x21   :  { %v123_v2 = vld [vmem:[#allocation2 + $0x20] sm:$0xff] (%p110_p1)  ;;  %vm167_vm0 = vcmask (%p110_p1), 261120   ;;  %v121_v4 = vld [vmem:[#allocation2 + $0x10] sm:$0xff] (%p110_p1)  ;;  %v124_v11 = vld [vmem:[#allocation2 + $0x28] sm:$0xff] (%p110_p1)  ;;  %v219_v33 = vlaneseq (%p110_p1)  ;;  %vm416_vm1 = vcmask (%p110_p1), 130112   ;;  %vm420_vm2 = vcmask (%p110_p1), 195712  }
  0x22   :  { %112 = sbr.rel (!%p110_p1) target bundleno = 28 (0x1c), region = 124  ;;  %v139_v3 = vld [vmem:[#allocation3 + $0x20] sm:$0xff] (%p110_p1)  ;;  %v137_v6 = vld [vmem:[#allocation3 + $0x10] sm:$0xff] (%p110_p1)  ;;  %v140_v12 = vld [vmem:[#allocation3 + $0x28] sm:$0xff] (%p110_p1)  ;;  %vm424_vm3 = vcmask (%p110_p1), 261312   ;;  %vm428_vm4 = vcmask (%p110_p1), 326912  }
  0x23   :  { %v155_v5 = vmul.f32 (%p110_p1), %v139_v3, %v123_v2  ;;  %v119_v7 = vld [vmem:[#allocation2] sm:$0xff] (%p110_p1)  ;;  %v153_v9 = vmul.f32 (%p110_p1), %v137_v6, %v121_v4  ;;  %v122_v13 = vld [vmem:[#allocation2 + $0x18] sm:$0xff] (%p110_p1)  ;;  %v120_v16 = vld [vmem:[#allocation2 + $0x8] sm:$0xff] (%p110_p1)  ;;  %v156_v20 = vmul.f32 (%p110_p1), %v140_v12, %v124_v11  ;;  %v654_v36 = vshrl.u32 (%p110_p1), %v219_v33, 7 }
  0x24   :  { %v135_v8 = vld [vmem:[#allocation3] sm:$0xff] (%p110_p1)  ;;  %v138_v15 = vld [vmem:[#allocation3 + $0x18] sm:$0xff] (%p110_p1)  ;;  %v136_v17 = vld [vmem:[#allocation3 + $0x8] sm:$0xff] (%p110_p1)  ;;  %vm432_vm5 = vcmask (%p110_p1), 392512   ;;  %vm436_vm6 = vcmask (%p110_p1), 458112   ;;  %vm440_vm7 = vcmask (%p110_p1), 523712  }
  0x25   :  { %v151_v10 = vmul.f32 (%p110_p1), %v135_v8, %v119_v7  ;;  %v180_v14 = vsel (%p110_p1), %vm167_vm0, %v155_v5, 0.0  ;;  %v174_v18 = vsel (%p110_p1), %vm167_vm0, %v153_v9, 0.0  ;;  %v154_v21 = vmul.f32 (%p110_p1), %v138_v15, %v122_v13  ;;  %v127_v24 = vld [vmem:[#allocation2 + $0x40] sm:$0xff] (%p110_p1)  ;;  %v126_v28 = vld [vmem:[#allocation2 + $0x38] sm:$0xff] (%p110_p1)  ;;  %v125_v30 = vld [vmem:[#allocation2 + $0x30] sm:$0xff] (%p110_p1)  ;;  %536 = vset.pattern.permute.xlu1 (%p110_p1), %v654_v36 }
  0x26   :  { %181 = vadd.xlane.f32.xlu2 (%p110_p1), %v180_v14  ;;  %175 = vadd.xlane.f32.xlu1 (%p110_p1), %v174_v18  ;;  %v152_v22 = vmul.f32 (%p110_p1), %v136_v17, %v120_v16  ;;  %v183_v23 = vsel (%p110_p1), %vm167_vm0, %v156_v20, 0.0  ;;  %v143_v27 = vld [vmem:[#allocation3 + $0x40] sm:$0xff] (%p110_p1)  ;;  %v142_v29 = vld [vmem:[#allocation3 + $0x38] sm:$0xff] (%p110_p1)  ;;  %v141_v31 = vld [vmem:[#allocation3 + $0x30] sm:$0xff] (%p110_p1)  ;;  %v227_v38 = vadd.s32 (%p110_p1), 8, %v654_v36  ;;  %v233_v39 = vadd.s32 (%p110_p1), 16, %v654_v36 }
  0x27   :  { %v168_v19 = vsel %vm167_vm0, %v151_v10, 0.0  ;;  %v177_v25 = vsel %vm167_vm0, %v154_v21, 0.0  ;;  %v159_v32 = vmul.f32 %v143_v27, %v127_v24  ;;  %v158_v34 = vmul.f32 %v142_v29, %v126_v28  ;;  %v130_v42 = vld [vmem:[#allocation2 + $0x58] sm:$0xff]  ;;  %v129_v44 = vld [vmem:[#allocation2 + $0x50] sm:$0xff]  ;;  %v128_v46 = vld [vmem:[#allocation2 + $0x48] sm:$0xff] }
  0x28   :  { %169 = vadd.xlane.f32.xlu0 %v168_v19  ;;  %v171_v26 = vsel %vm167_vm0, %v152_v22, 0.0  ;;  %v157_v35 = vmul.f32 %v141_v31, %v125_v30  ;;  %v146_v43 = vld [vmem:[#allocation3 + $0x58] sm:$0xff]  ;;  %v145_v45 = vld [vmem:[#allocation3 + $0x50] sm:$0xff]  ;;  %v144_v47 = vld [vmem:[#allocation3 + $0x48] sm:$0xff]  ;;  %537 = vset.pattern.permute.xlu2 %v227_v38  ;;  %v239_v7 = vadd.s32 24, %v654_v36  ;;  %v245_v8 = vadd.s32 32, %v654_v36 }
  0x29   :  { %v192_v37 = vsel %vm167_vm0, %v159_v32, 0.0  ;;  %v189_v40 = vsel %vm167_vm0, %v158_v34, 0.0  ;;  %538 = vset.pattern.permute.xlu0 %v233_v39  ;;  %v162_v48 = vmul.f32 %v146_v43, %v130_v42  ;;  %v161_v49 = vmul.f32 %v145_v45, %v129_v44  ;;  %v133_v54 = vld [vmem:[#allocation2 + $0x70] sm:$0xff]  ;;  %v132_v56 = vld [vmem:[#allocation2 + $0x68] sm:$0xff]  ;;  %v131_v58 = vld [vmem:[#allocation2 + $0x60] sm:$0xff] }
  0x2a   :  { %v186_v41 = vsel %vm167_vm0, %v157_v35, 0.0  ;;  %v160_v50 = vmul.f32 %v144_v47, %v128_v46  ;;  %v149_v55 = vld [vmem:[#allocation3 + $0x70] sm:$0xff]  ;;  %v148_v57 = vld [vmem:[#allocation3 + $0x68] sm:$0xff]  ;;  %v147_v59 = vld [vmem:[#allocation3 + $0x60] sm:$0xff]  ;;  %v275_v9 = vadd.s32 72, %v654_v36  ;;  %v251_v10 = vadd.s32 40, %v654_v36 }
  0x2b   :  { %v201_v51 = vsel %vm167_vm0, %v162_v48, 0.0  ;;  %v198_v52 = vsel %vm167_vm0, %v161_v49, 0.0  ;;  %v165_v60 = vmul.f32 %v149_v55, %v133_v54  ;;  %v164_v61 = vmul.f32 %v148_v57, %v132_v56  ;;  %v134_v2 = vld [vmem:[#allocation2 + $0x78] sm:$0xff]  ;;  %v555_v6 = vld [vmem:[%s690_s2] ss:$0 sm:$0xff] }
  0x2c   :  { %v195_v53 = vsel %vm167_vm0, %v160_v50, 0.0  ;;  %v163_v62 = vmul.f32 %v147_v59, %v131_v58  ;;  %v150_v3 = vld [vmem:[#allocation3 + $0x78] sm:$0xff]  ;;  %v257_v11 = vadd.s32 48, %v654_v36  ;;  %v305_v12 = vadd.s32 112, %v654_v36 }
  0x2d   :  { %v210_v63 = vsel %vm167_vm0, %v165_v60, 0.0  ;;  %v207_v0 = vsel %vm167_vm0, %v164_v61, 0.0  ;;  %v166_v4 = vmul.f32 %v150_v3, %v134_v2  ;;  %v263_v13 = vadd.s32 56, %v654_v36 }
  0x2e   :  { %184 = vadd.xlane.f32.xlu2 %v183_v23  ;;  %178 = vadd.xlane.f32.xlu1 %v177_v25  ;;  %v204_v1 = vsel %vm167_vm0, %v163_v62, 0.0  ;;  %v269_v14 = vadd.s32 64, %v654_v36  ;;  %v281_v15 = vadd.s32 80, %v654_v36  ;;  %v287_v16 = vadd.s32 88, %v654_v36 }
  0x2f   :  { %v213_v5 = vsel %vm167_vm0, %v166_v4, 0.0  ;;  %v293_v21 = vadd.s32 96, %v654_v36  ;;  %v299_v22 = vadd.s32 104, %v654_v36  ;;  %v604_v25 = vmov 0  }
  0x30   :  { %172 = vadd.xlane.f32.xlu0 %v171_v26  ;;  %v311_v29 = vadd.s32 120, %v654_v36  ;;  %vm444_vm8 = vcmask 589312   ;;  %vm448_vm9 = vcmask 654912   ;;  %vm452_vm10 = vcmask 720512  }
  0x31   :  { %vm456_vm11 = vcmask 786112   ;;  %vm460_vm12 = vcmask 851712   ;;  %vm464_vm13 = vcmask 917312   ;;  %vm468_vm14 = vcmask 982912  }
  0x32   :  { %vm472_vm15 = vcmask 1048512  }
  0x36   :  { %193 = vadd.xlane.f32.xlu2 %v192_v37  ;;  %190 = vadd.xlane.f32.xlu1 %v189_v40 }
  0x38   :  { %187 = vadd.xlane.f32.xlu0 %v186_v41 }
  0x3e   :  { %202 = vadd.xlane.f32.xlu2 %v201_v51  ;;  %199 = vadd.xlane.f32.xlu1 %v198_v52 }
  0x40   :  { %196 = vadd.xlane.f32.xlu0 %v195_v53 }
  0x46   :  { %211 = vadd.xlane.f32.xlu2 %v210_v63  ;;  %208 = vadd.xlane.f32.xlu1 %v207_v0 }
  0x48   :  { %205 = vadd.xlane.f32.xlu0 %v204_v1 }
  0x50   :  { %214 = vadd.xlane.f32.xlu0 %v213_v5 }
  0x5e   :  { %229 = vperm.xlu2 %537, %v555_v6  }
  0x5f   :  { %223 = vperm.xlu1 %536, %v555_v6  }
  0x64   :  { %235 = vperm.xlu0 %538, %v555_v6  }
  0x66   :  { %539 = vset.pattern.permute.xlu2 %v239_v7 }
  0x67   :  { %540 = vset.pattern.permute.xlu1 %v245_v8 }
  0x6c   :  { %545 = vset.pattern.permute.xlu0 %v275_v9 }
  0x6e   :  { %241 = vperm.xlu2 %539, %v555_v6  }
  0x6f   :  { %247 = vperm.xlu1 %540, %v555_v6  }
  0x74   :  { %277 = vperm.xlu0 %545, %v555_v6  }
  0x76   :  { %541 = vset.pattern.permute.xlu2 %v251_v10  ;;  %v412_v10 = vand.u32 127, %v219_v33 }
  0x77   :  { %542 = vset.pattern.permute.xlu1 %v257_v11 }
  0x78   :  { %v418_v11 = vadd.s32 4294967280, %v412_v10 }
  0x7c   :  { %550 = vset.pattern.permute.xlu0 %v305_v12  ;;  %v414_v12 = vadd.s32 4294967288, %v412_v10 }
  0x7e   :  { %253 = vperm.xlu2 %541, %v555_v6  }
  0x7f   :  { %259 = vperm.xlu1 %542, %v555_v6  }
  0x84   :  { %307 = vperm.xlu0 %550, %v555_v6  }
  0x86   :  { %543 = vset.pattern.permute.xlu2 %v263_v13 }
  0x87   :  { %544 = vset.pattern.permute.xlu1 %v269_v14 }
  0x8c   :  { %554 = vset.pattern.permute.xlu0 %v604_v25 }
  0x8e   :  { %265 = vperm.xlu2 %543, %v555_v6  }
  0x8f   :  { %271 = vperm.xlu1 %544, %v555_v6  }
  0x96   :  { %546 = vset.pattern.permute.xlu2 %v281_v15 }
  0x97   :  { %547 = vset.pattern.permute.xlu1 %v287_v16 }
  0x99   :  { %v182_v17 = vpop.xlane.xlu2 %181  ;;  %v176_v20 = vpop.xlane.xlu1 %175 }
  0x9b   :  { %v170_v18 = vpop.xlane.xlu0 %169 }
  0x9e   :  { %283 = vperm.xlu2 %546, %v555_v6  }
  0x9f   :  { %289 = vperm.xlu1 %547, %v555_v6  }
  0xa1   :  { %v185_v19 = vpop.xlane.xlu2 %184  ;;  %v179_v26 = vpop.xlane.xlu1 %178 }
  0xa3   :  { %v173_v23 = vpop.xlane.xlu0 %172 }
  0xa6   :  { %548 = vset.pattern.permute.xlu2 %v293_v21  ;;  %v430_v21 = vadd.s32 4294967256, %v412_v10 }
  0xa7   :  { %549 = vset.pattern.permute.xlu1 %v299_v22  ;;  %v426_v22 = vadd.s32 4294967264, %v412_v10 }
  0xa9   :  { %v194_v24 = vpop.xlane.xlu2 %193  ;;  %v191_v30 = vpop.xlane.xlu1 %190 }
  0xab   :  { %v188_v27 = vpop.xlane.xlu0 %187 }
  0xae   :  { %295 = vperm.xlu2 %548, %v555_v6  }
  0xaf   :  { %301 = vperm.xlu1 %549, %v555_v6  }
  0xb1   :  { %v203_v28 = vpop.xlane.xlu2 %202  ;;  %v200_v34 = vpop.xlane.xlu1 %199 }
  0xb3   :  { %v197_v32 = vpop.xlane.xlu0 %196 }
  0xb6   :  { %551 = vset.pattern.permute.xlu2 %v311_v29  ;;  %v434_v29 = vadd.s32 4294967248, %v412_v10 }
  0xb7   :  { %552 = vset.pattern.permute.xlu1 %v604_v25 }
  0xb9   :  { %v212_v31 = vpop.xlane.xlu2 %211  ;;  %v209_v40 = vpop.xlane.xlu1 %208 }
  0xbb   :  { %v206_v38 = vpop.xlane.xlu0 %205 }
  0xbe   :  { %313 = vperm.xlu2 %551, %v555_v6  }
  0xc1   :  { %v230_v35 = vpop.permute.xlu2 %229 }
  0xc2   :  { %v332_v37 = vadd.f32 %v230_v35, %v173_v23 }
  0xc3   :  { %v215_v42 = vpop.xlane.xlu0 %214 }
  0xc6   :  { %553 = vset.pattern.permute.xlu2 %v604_v25 }
  0xc7   :  { %367 = vperm.xlu2 %553, %v332_v37  }
  0xc9   :  { %v242_v39 = vpop.permute.xlu2 %241 }
  0xca   :  { %v334_v41 = vadd.f32 %v242_v39, %v179_v26 }
  0xcc   :  { %373 = vperm.xlu0 %554, %v334_v41  }
  0xd1   :  { %v224_v43 = vpop.permute.xlu1 %223 }
  0xd2   :  { %v331_v44 = vadd.f32 %v224_v43, %v170_v18 }
  0xd4   :  { %364 = vperm.xlu1 %552, %v331_v44   ;;  %v454_v44 = vadd.s32 4294967208, %v412_v10 }
  0xd6   :  { %v236_v36 = vpop.permute.xlu0 %235 }
  0xd7   :  { %v333_v45 = vadd.f32 %v236_v36, %v176_v20 }
  0xd8   :  { %v254_v46 = vpop.permute.xlu2 %253 }
  0xd9   :  { %v336_v48 = vadd.f32 %v254_v46, %v185_v19  ;;  %v422_v19 = vadd.s32 4294967272, %v412_v10 }
  0xdc   :  { %370 = vperm.xlu1 %552, %v333_v45   ;;  %v450_v45 = vadd.s32 4294967216, %v412_v10 }
  0xe1   :  { %v248_v47 = vpop.permute.xlu1 %247 }
  0xe2   :  { %v335_v49 = vadd.f32 %v248_v47, %v182_v17 }
  0xe4   :  { %376 = vperm.xlu2 %553, %v335_v49   ;;  %379 = vperm.xlu1 %552, %v336_v48  }
  0xe6   :  { %v278_v54 = vpop.permute.xlu0 %277 }
  0xe7   :  { %v340_v57 = vadd.f32 %v278_v54, %v197_v32  ;;  %v442_v32 = vadd.s32 4294967232, %v412_v10 }
  0xe8   :  { %v266_v50 = vpop.permute.xlu2 %265 }
  0xe9   :  { %v338_v51 = vadd.f32 %v266_v50, %v191_v30 }
  0xec   :  { %385 = vperm.xlu1 %552, %v338_v51   ;;  %v458_v51 = vadd.s32 4294967200, %v412_v10 }
  0xf1   :  { %v260_v52 = vpop.permute.xlu1 %259 }
  0xf2   :  { %v337_v53 = vadd.f32 %v260_v52, %v188_v27  ;;  %v438_v27 = vadd.s32 4294967240, %v412_v10 }
  0xf4   :  { %382 = vperm.xlu2 %553, %v337_v53   ;;  %v462_v53 = vadd.s32 4294967192, %v412_v10 }
  0xf6   :  { %v308_v0 = vpop.permute.xlu0 %307 }
  0xf7   :  { %v345_v3 = vadd.f32 %v308_v0, %v212_v31 }
  0xf8   :  { %v284_v55 = vpop.permute.xlu2 %283 }
  0xf9   :  { %v341_v56 = vadd.f32 %v284_v55, %v200_v34  ;;  %v466_v55 = vadd.s32 4294967184, %v412_v10 }
  0xfb   :  { %394 = vperm.xlu1 %552, %v341_v56   ;;  %v470_v56 = vadd.s32 4294967176, %v412_v10 }
  0xfc   :  { %391 = vperm.xlu2 %553, %v340_v57  }
 0x101   :  { %v272_v58 = vpop.permute.xlu1 %271 }
 0x102   :  { %v339_v59 = vadd.f32 %v272_v58, %v194_v24 }
 0x104   :  { %388 = vperm.xlu0 %554, %v339_v59  }
 0x108   :  { %v296_v60 = vpop.permute.xlu2 %295 }
 0x109   :  { %v343_v61 = vadd.f32 %v296_v60, %v206_v38 }
 0x10b   :  { %400 = vperm.xlu2 %553, %v343_v61  }
 0x111   :  { %v290_v62 = vpop.permute.xlu1 %289 }
 0x112   :  { %v342_v63 = vadd.f32 %v290_v62, %v203_v28 }
 0x114   :  { %397 = vperm.xlu0 %554, %v342_v63  }
 0x118   :  { %v314_v1 = vpop.permute.xlu2 %313 }
 0x119   :  { %v346_v2 = vadd.f32 %v314_v1, %v215_v42 }
 0x11b   :  { %409 = vperm.xlu2 %553, %v346_v2  }
 0x11c   :  { %406 = vperm.xlu0 %554, %v345_v3  }
 0x121   :  { %v302_v4 = vpop.permute.xlu1 %301  ;;  %v368_v7 = vpop.permute.xlu2 %367 }
 0x122   :  { %v344_v5 = vadd.f32 %v302_v4, %v209_v40  ;;  %v415_v18 = vperm.slane %v368_v7, %v414_v12  ;;  %v446_v40 = vadd.s32 4294967224, %v412_v10 }
 0x124   :  { %403 = vperm.xlu1 %552, %v344_v5  }
 0x13e   :  { %v377_v9 = vpop.permute.xlu2 %376  ;;  %v374_v13 = vpop.permute.xlu0 %373 }
 0x13f   :  { %v423_v24 = vperm.slane %v374_v13, %v422_v19  ;;  %v427_v28 = vperm.slane %v377_v9, %v426_v22 }
 0x146   :  { %v365_v6 = vpop.permute.xlu1 %364 }
 0x147   :  { %v413_v16 = vperm.slane %v365_v6, %v412_v10 }
 0x149   :  { %v417_v20 = vsel %vm416_vm1, %v415_v18, %v413_v16 }
 0x14e   :  { %v371_v8 = vpop.permute.xlu1 %370  ;;  %v383_v14 = vpop.permute.xlu2 %382 }
 0x14f   :  { %v419_v17 = vperm.slane %v371_v8, %v418_v11  ;;  %v435_v38 = vperm.slane %v383_v14, %v434_v29 }
 0x151   :  { %v421_v23 = vsel %vm420_vm2, %v419_v17, %v417_v20 }
 0x152   :  { %v425_v26 = vsel %vm424_vm3, %v423_v24, %v421_v23 }
 0x153   :  { %v429_v34 = vsel %vm428_vm4, %v427_v28, %v425_v26 }
 0x156   :  { %v380_v15 = vpop.permute.xlu1 %379  ;;  %v392_v30 = vpop.permute.xlu2 %391 }
 0x157   :  { %v431_v33 = vperm.slane %v380_v15, %v430_v21  ;;  %v447_v48 = vperm.slane %v392_v30, %v446_v40 }
 0x159   :  { %v433_v35 = vsel %vm432_vm5, %v431_v33, %v429_v34 }
 0x15a   :  { %v437_v42 = vsel %vm436_vm6, %v435_v38, %v433_v35 }
 0x15e   :  { %v386_v31 = vpop.permute.xlu1 %385 }
 0x15f   :  { %v439_v37 = vperm.slane %v386_v31, %v438_v27 }
 0x161   :  { %v441_v43 = vsel %vm440_vm7, %v439_v37, %v437_v42 }
 0x165   :  { %v401_v36 = vpop.permute.xlu2 %400 }
 0x166   :  { %v459_v59 = vperm.slane %v401_v36, %v458_v51 }
 0x16d   :  { %v395_v46 = vpop.permute.xlu1 %394 }
 0x16e   :  { %v451_v52 = vperm.slane %v395_v46, %v450_v45 }
 0x175   :  { %v410_v60 = vpop.permute.xlu2 %409 }
 0x176   :  { %v389_v25 = vpop.permute.xlu0 %388  ;;  %v471_v1 = vperm.slane %v410_v60, %v470_v56 }
 0x177   :  { %v443_v39 = vperm.slane %v389_v25, %v442_v32 }
 0x179   :  { %v445_v47 = vsel %vm444_vm8, %v443_v39, %v441_v43 }
 0x17a   :  { %v449_v49 = vsel %vm448_vm9, %v447_v48, %v445_v47 }
 0x17b   :  { %v453_v54 = vsel %vm452_vm10, %v451_v52, %v449_v49 }
 0x186   :  { %v398_v41 = vpop.permute.xlu0 %397 }
 0x187   :  { %v455_v50 = vperm.slane %v398_v41, %v454_v44 }
 0x189   :  { %v457_v57 = vsel %vm456_vm11, %v455_v50, %v453_v54 }
 0x18a   :  { %v461_v0 = vsel %vm460_vm12, %v459_v59, %v457_v57 }
 0x18e   :  { %v407_v58 = vpop.permute.xlu0 %406 }
 0x18f   :  { %v467_v63 = vperm.slane %v407_v58, %v466_v55 }
 0x196   :  { %v404_v61 = vpop.permute.xlu1 %403 }
 0x197   :  { %v463_v62 = vperm.slane %v404_v61, %v462_v53 }
 0x199   :  { %v465_v2 = vsel %vm464_vm13, %v463_v62, %v461_v0 }
 0x19a   :  { %v469_v3 = vsel %vm468_vm14, %v467_v63, %v465_v2 }
 0x19b   :  { %v473_v4 = vsel %vm472_vm15, %v471_v1, %v469_v3 }
 0x19c   :  { %475 = vst [vmem:[%s693_s5] sm:$0x1] %v473_v4 }
 0x19d   :  { %480 = vsyncmov [#allocation4] }
 0x1a0   :  { %s481_s12 = vpop.sfrf %480 }
 0x1a1   :  { %p515_p2 = scmp.ne.s32.totalorder %s481_s12, 0 }
 0x1a3   :  { %485 = shalt.err (%p515_p2)  }
 0x1a4   :  { %487 = vsyncmov [#allocation4 + $0x1] }
 0x1a7   :  { %s488_s13 = vpop.sfrf %487 }
 0x1a8   :  { %p516_p3 = scmp.ne.s32.totalorder %s488_s13, 0 }
 0x1aa   :  { %492 = shalt.err (%p516_p3)  }

</bundles_post_ra>
